<compile_context>
chip_gen: v7x
topology: tpu7x:2x2x1
jax: 0.10.0
libtpu: 0.0.40
codegen_flags: <defaults>
</compile_context>

<pallas_src>
import functools

import jax
import jax.numpy as jnp
from jax import lax
from jax.experimental import pallas as pl
from jax.experimental.pallas import tpu as pltpu

_DELTA = 5.0
_LANES = 128
_SUB = 8


def _adap_loss_kernel(pred_ref, true_ref, sq_ref, ab_ref, hb_ref, *,
                      bb: int, ts: int, strips, rows_total: int,
                      ragged: bool, delta: float):
    """Accumulates per-sample sum(d^2), sum(|d|), sum(huber_unhalved).

    pred_ref/true_ref: (bb, ts, 128) blocks in the ORIGINAL dtype.
    sq/ab/hb_ref:      (bb, 8, 128) f32 output blocks, revisited across the
                       chunk axis (grid axis 1) -> per-sample accumulators.
    """
    c = pl.program_id(1)
    nc = pl.num_programs(1)

    @pl.when(c == 0)
    def _init():
        sq_ref[...] = jnp.zeros_like(sq_ref)
        ab_ref[...] = jnp.zeros_like(ab_ref)
        hb_ref[...] = jnp.zeros_like(hb_ref)

    def accumulate(mask_rows: bool):
        for r0, rlen in strips:
            # Cast on the loaded strip (inputs stay in original dtype in HBM/VMEM).
            p = pred_ref[:, r0:r0 + rlen, :].astype(jnp.float32)
            t = true_ref[:, r0:r0 + rlen, :].astype(jnp.float32)
            d = p - t
            if mask_rows:
                # Ragged tail chunk: rows past the (row-padded) sample are DMA
                # garbage; zero them (select, so NaN garbage can't propagate).
                valid = (rows_total - c * ts) - r0
                row = lax.broadcasted_iota(jnp.int32, (bb, rlen, _LANES), 1)
                d = jnp.where(row < valid, d, 0.0)
            sq = d * d
            ad = jnp.abs(d)
            # Un-halved Huber (0.5 folded into the finalize); reuses sq.
            hub = jnp.where(ad <= delta, sq, (2.0 * delta) * ad - delta * delta)
            # Fold the strip's sublane axis onto the (bb, 8, 128) accumulators:
            # pure VPU adds (the reshape is a layout-preserving view); the
            # cross-lane collapse happens once per sample, in the wrapper.
            q = rlen // _SUB
            sq_ref[...] += sq.reshape(bb, q, _SUB, _LANES).sum(axis=1)
            ab_ref[...] += ad.reshape(bb, q, _SUB, _LANES).sum(axis=1)
            hb_ref[...] += hub.reshape(bb, q, _SUB, _LANES).sum(axis=1)

    if ragged:
        # Only the last chunk of a sample can contain out-of-bounds rows;
        # keep the fast (unmasked) path for all other chunks.
        @pl.when(c == nc - 1)
        def _tail():
            accumulate(True)

        @pl.when(c != nc - 1)
        def _full():
            accumulate(False)
    else:
        accumulate(False)


def _round_up(x: int, m: int) -> int:
    return -(-x // m) * m


def _largest_divisor_leq(n: int, cap: int) -> int:
    cap = max(1, min(cap, n))
    return max(d for d in range(1, cap + 1) if n % d == 0)


def adap_loss(y_pred_logits, y_true, *,
              block_bytes: int = 2 * 1024 * 1024, strip_rows: int = 512):
    """Pallas implementation of AdapLoss.forward. Returns a scalar f32."""
    B = int(y_true.shape[0])
    p = y_pred_logits.reshape(B, -1)              # no cast, no copy
    t = y_true.reshape(B, -1)
    n_valid = int(p.shape[1])
    assert int(t.shape[1]) == n_valid, "pred/true feature counts differ"

    isz_p = jnp.dtype(p.dtype).itemsize
    isz_t = jnp.dtype(t.dtype).itemsize
    isz_max = max(isz_p, isz_t)
    # Most restrictive sublane packing of the two inputs (smallest itemsize).
    sub_pack = {4: 8, 2: 16, 1: 32}.get(min(isz_p, isz_t), 8)

    # Pad in the ORIGINAL dtype, only to an (8*128)-element boundary (<= 1023
    # elements per sample).  Padded zeros are loss-neutral (d == 0) and the
    # means divide by the true n_valid.  Aligned shapes emit no pad at all.
    n_pad = _round_up(n_valid, _SUB * _LANES)
    if n_pad != n_valid:
        p = jnp.pad(p, ((0, 0), (0, n_pad - n_valid)))
        t = jnp.pad(t, ((0, 0), (0, n_pad - n_valid)))
    S = n_pad // _LANES
    p = p.reshape(B, S, _LANES)
    t = t.reshape(B, S, _LANES)

    # Strip length (rows) for the in-kernel loop: multiple of the tightest
    # sublane pack so strip slices never split packed bf16/int8 rows.
    strip = _round_up(max(strip_rows, sub_pack), sub_pack)
    # DMA block target: ~block_bytes for the widest input per grid step.
    rows_target = max(strip, (block_bytes // (_LANES * isz_max)) // strip * strip)

    if S > rows_target:
        # Large samples: one sample per step, chunk the feature rows.
        bb = 1
        nc = -(-S // rows_target)
        ts = _round_up(-(-S // nc), strip)        # multiple of strip (and sub)
        nc = -(-S // ts)
        ragged = (nc * ts != S)                   # tail chunk masked in-kernel
    else:
        # Small samples: whole sample per chunk; fuse several samples per step
        # to amortize per-grid-step overhead and fatten the DMA.
        ts = S
        nc = 1
        ragged = False
        cap_bytes = min(block_bytes, 1 << 20)     # bound f32 temporaries
        bb = _largest_divisor_leq(
            B, min(32, max(1, cap_bytes // (S * _LANES * 4))))
        # v7x megacore: keep >= 2 batch blocks so both TensorCores get work.
        if B >= 2 and B // bb < 2:
            bb = _largest_divisor_leq(B, max(1, bb // 2))
    nb = B // bb

    # Static strip table (start, length); last strip may be shorter (mult of 8).
    strips, r = [], 0
    while r < ts:
        rl = min(strip, ts - r)
        strips.append((r, rl))
        r += rl
    strips = tuple(strips)

    kernel = functools.partial(
        _adap_loss_kernel, bb=bb, ts=ts, strips=strips,
        rows_total=S, ragged=ragged, delta=_DELTA)

    acc_shape = jax.ShapeDtypeStruct((B, _SUB, _LANES), jnp.float32)
    acc_spec = pl.BlockSpec((bb, _SUB, _LANES), lambda i, c: (i, 0, 0))
    in_spec = pl.BlockSpec((bb, ts, _LANES), lambda i, c: (i, c, 0))

    sq, ab, hb = pl.pallas_call(
        kernel,
        out_shape=(acc_shape, acc_shape, acc_shape),
        grid_spec=pltpu.PrefetchScalarGridSpec(
            num_scalar_prefetch=0,
            grid=(nb, nc),
            in_specs=[in_spec, in_spec],
            out_specs=[acc_spec, acc_spec, acc_spec],
        ),
        compiler_params=pltpu.CompilerParams(
            # Batch-block axis parallel (megacore); chunk axis is the per-sample
            # reduction -> arbitrary and last.
            dimension_semantics=("parallel", "arbitrary"),
            vmem_limit_bytes=32 * 1024 * 1024,
        ),
        cost_estimate=pl.CostEstimate(
            flops=10 * B * n_pad,
            transcendentals=0,
            bytes_accessed=B * n_pad * (isz_p + isz_t)
            + 3 * B * _SUB * _LANES * 4,
        ),
    )(p, t)

    # Tiny per-sample finalize (3 scalars/sample): cross-lane collapse, the
    # L2-vs-Huber branch, and the batch mean.  Matches the PyTorch module's
    # per-sample decision followed by torch.mean.
    inv_n = 1.0 / float(n_valid)
    l2 = jnp.sum(sq, axis=(1, 2)) * inv_n                 # per-sample MSE
    l1 = jnp.sum(ab, axis=(1, 2)) * inv_n                 # per-sample L1
    lh = jnp.sum(hb, axis=(1, 2)) * (0.5 * inv_n)         # Huber mean (0.5 here)
    use_l2 = jnp.logical_or(l2 <= 1.0, l2 < l1 * l1)
    return jnp.mean(jnp.where(use_l2, l2, lh))


def adap_loss_ref(y_pred_logits, y_true):
    """Pure-JAX reference mirroring the PyTorch module."""
    B = y_true.shape[0]
    p = y_pred_logits.astype(jnp.float32).reshape(B, -1)
    t = y_true.astype(jnp.float32).reshape(B, -1)
    d = p - t
    ad = jnp.abs(d)
    l2 = jnp.mean(d * d, axis=1)
    l1 = jnp.mean(ad, axis=1)
    delta = _DELTA
    hub = jnp.where(ad <= delta, 0.5 * d * d, delta * (ad - 0.5 * delta))
    lh = jnp.mean(hub, axis=1)
    loss = jnp.where(jnp.logical_or(l2 <= 1.0, l2 < l1 * l1), l2, lh)
    return jnp.mean(loss)


if __name__ == "__main__":
    # AdapLoss has no learnable parameters - nothing to initialize.
    key = jax.random.PRNGKey(0)
    k1, k2, k3, k4 = jax.random.split(key, 4)

    # Test 1: f32, feature count an exact multiple of 1024 (no pad, fused batch).
    y_pred = jax.random.normal(k1, (2, 4, 16, 16), jnp.float32) * 4.0
    y_true = jax.random.normal(k2, (2, 4, 16, 16), jnp.float32)
    out = jax.block_until_ready(adap_loss(y_pred, y_true))
    ref = jax.block_until_ready(adap_loss_ref(y_pred, y_true))
    assert jnp.allclose(out, ref, rtol=1e-5, atol=1e-5), (out, ref)

    # Test 2: bf16 inputs with a ragged feature count (small in-dtype pad only,
    # in-kernel cast to f32).
    y_pred2 = (jax.random.normal(k3, (2, 3, 20, 20), jnp.float32) * 4.0).astype(jnp.bfloat16)
    y_true2 = jax.random.normal(k4, (2, 3, 20, 20), jnp.float32).astype(jnp.bfloat16)
    out2 = jax.block_until_ready(adap_loss(y_pred2, y_true2))
    ref2 = jax.block_until_ready(adap_loss_ref(y_pred2, y_true2))
    assert jnp.allclose(out2, ref2, rtol=1e-4, atol=1e-4), (out2, ref2)

    # Test 3: force several chunks per sample (accumulator-across-chunks path).
    y_pred3 = jax.random.normal(k1, (2, 4, 32, 32), jnp.float32) * 4.0
    y_true3 = jax.random.normal(k2, (2, 4, 32, 32), jnp.float32)
    out3 = jax.block_until_ready(
        adap_loss(y_pred3, y_true3, block_bytes=8 * 128 * 4, strip_rows=8))
    ref3 = jax.block_until_ready(adap_loss_ref(y_pred3, y_true3))
    assert jnp.allclose(out3, ref3, rtol=1e-5, atol=1e-5), (out3, ref3)

    # Test 4: multi-chunk + ragged tail chunk (in-kernel row mask path).
    y_pred4 = jax.random.normal(k3, (2, 4, 24, 24), jnp.float32) * 4.0
    y_true4 = jax.random.normal(k4, (2, 4, 24, 24), jnp.float32)
    out4 = jax.block_until_ready(
        adap_loss(y_pred4, y_true4, block_bytes=16 * 128 * 4, strip_rows=16))
    ref4 = jax.block_until_ready(adap_loss_ref(y_pred4, y_true4))
    assert jnp.allclose(out4, ref4, rtol=1e-5, atol=1e-5), (out4, ref4)

    # Test 5: mixed dtypes (pred f32, true bf16) - strip granularity follows the
    # tightest (bf16) packing.
    y_pred5 = jax.random.normal(k1, (2, 4, 16, 32), jnp.float32) * 4.0
    y_true5 = jax.random.normal(k2, (2, 4, 16, 32), jnp.float32).astype(jnp.bfloat16)
    out5 = jax.block_until_ready(adap_loss(y_pred5, y_true5))
    ref5 = jax.block_until_ready(adap_loss_ref(y_pred5, y_true5))
    assert jnp.allclose(out5, ref5, rtol=1e-4, atol=1e-4), (out5, ref5)

    print("KERNEL_OK")
</pallas_src>

<mosaic_0001>
module attributes {stable_mosaic.version = 11 : i64} {
  func.func @_adap_loss_kernel(%arg0: i32, %arg1: i32, %arg2: memref<1x8x128xf32, #tpu.memory_space<vmem>>, %arg3: memref<1x8x128xf32, #tpu.memory_space<vmem>>, %arg4: memref<1x8x128xf32, #tpu.memory_space<vmem>>, %arg5: memref<1x8x128xf32, #tpu.memory_space<vmem>>, %arg6: memref<1x8x128xf32, #tpu.memory_space<vmem>>) attributes {dimension_semantics = [#tpu.dimension_semantics<parallel>, #tpu.dimension_semantics<arbitrary>], iteration_bounds = array<i64: 2, 1>, scalar_prefetch = 0 : i64, scratch_operands = 0 : i64, tpu.core_type = #tpu.core_type<tc>, window_params = [{transform_indices = @transform_0, window_bounds = array<i64: 1, 8, 128>}, {transform_indices = @transform_1, window_bounds = array<i64: 1, 8, 128>}, {transform_indices = @transform_2, window_bounds = array<i64: 1, 8, 128>}, {transform_indices = @transform_3, window_bounds = array<i64: 1, 8, 128>}, {transform_indices = @transform_4, window_bounds = array<i64: 1, 8, 128>}]} {
    %c0_i32 = arith.constant 0 : i32
    %0 = arith.cmpi eq, %arg1, %c0_i32 : i32
    %1 = arith.extui %0 : i1 to i32
    %c0_i32_0 = arith.constant 0 : i32
    %2 = arith.cmpi ne, %1, %c0_i32_0 : i32
    scf.if %2 {
      %cst_29 = arith.constant 0.000000e+00 : f32
      %30 = vector.broadcast %cst_29 : f32 to vector<1x8x128xf32>
      %c0_30 = arith.constant 0 : index
      %c0_31 = arith.constant 0 : index
      %c0_32 = arith.constant 0 : index
      %31 = vector.load %arg4[%c0_30, %c0_31, %c0_32] : memref<1x8x128xf32, #tpu.memory_space<vmem>>, vector<1x8x128xf32>
      tpu.vector_store %arg4[%c0_30, %c0_31, %c0_32], %30 {strides = array<i32>} : memref<1x8x128xf32, #tpu.memory_space<vmem>>, vector<1x8x128xf32>,
      %cst_33 = arith.constant 0.000000e+00 : f32
      %32 = vector.broadcast %cst_33 : f32 to vector<1x8x128xf32>
      %c0_34 = arith.constant 0 : index
      %c0_35 = arith.constant 0 : index
      %c0_36 = arith.constant 0 : index
      %33 = vector.load %arg5[%c0_34, %c0_35, %c0_36] : memref<1x8x128xf32, #tpu.memory_space<vmem>>, vector<1x8x128xf32>
      tpu.vector_store %arg5[%c0_34, %c0_35, %c0_36], %32 {strides = array<i32>} : memref<1x8x128xf32, #tpu.memory_space<vmem>>, vector<1x8x128xf32>,
      %cst_37 = arith.constant 0.000000e+00 : f32
      %34 = vector.broadcast %cst_37 : f32 to vector<1x8x128xf32>
      %c0_38 = arith.constant 0 : index
      %c0_39 = arith.constant 0 : index
      %c0_40 = arith.constant 0 : index
      %35 = vector.load %arg6[%c0_38, %c0_39, %c0_40] : memref<1x8x128xf32, #tpu.memory_space<vmem>>, vector<1x8x128xf32>
      tpu.vector_store %arg6[%c0_38, %c0_39, %c0_40], %34 {strides = array<i32>} : memref<1x8x128xf32, #tpu.memory_space<vmem>>, vector<1x8x128xf32>,
    } else {
    }
    %c0 = arith.constant 0 : index
    %c0_1 = arith.constant 0 : index
    %c0_2 = arith.constant 0 : index
    %3 = vector.load %arg2[%c0, %c0_1, %c0_2] : memref<1x8x128xf32, #tpu.memory_space<vmem>>, vector<1x8x128xf32>
    %c0_3 = arith.constant 0 : index
    %c0_4 = arith.constant 0 : index
    %c0_5 = arith.constant 0 : index
    %4 = vector.load %arg3[%c0_3, %c0_4, %c0_5] : memref<1x8x128xf32, #tpu.memory_space<vmem>>, vector<1x8x128xf32>
    %5 = arith.subf %3, %4 : vector<1x8x128xf32>
    %6 = arith.mulf %5, %5 : vector<1x8x128xf32>
    %7 = math.absf %5 : vector<1x8x128xf32>
    %cst = arith.constant 5.000000e+00 : f32
    %8 = vector.broadcast %cst : f32 to vector<1x8x128xf32>
    %9 = arith.cmpf ole, %7, %8 : vector<1x8x128xf32>
    %cst_6 = arith.constant 1.000000e+01 : f32
    %10 = vector.broadcast %cst_6 : f32 to vector<1x8x128xf32>
    %11 = arith.mulf %10, %7 : vector<1x8x128xf32>
    %cst_7 = arith.constant 2.500000e+01 : f32
    %12 = vector.broadcast %cst_7 : f32 to vector<1x8x128xf32>
    %13 = arith.subf %11, %12 : vector<1x8x128xf32>
    %14 = arith.select %9, %6, %13 : vector<1x8x128xi1>, vector<1x8x128xf32>
    %c0_8 = arith.constant 0 : index
    %c0_9 = arith.constant 0 : index
    %c0_10 = arith.constant 0 : index
    %15 = vector.load %arg4[%c0_8, %c0_9, %c0_10] : memref<1x8x128xf32, #tpu.memory_space<vmem>>, vector<1x8x128xf32>
    %16 = vector.shape_cast %6 : vector<1x8x128xf32> to vector<1x1x8x128xf32>
    %cst_11 = arith.constant dense<0.000000e+00> : vector<1x8x128xf32>
    %17 = vector.multi_reduction <add>, %16, %cst_11 [1] : vector<1x1x8x128xf32> to vector<1x8x128xf32>
    %18 = arith.addf %15, %17 : vector<1x8x128xf32>
    %c0_12 = arith.constant 0 : index
    %c0_13 = arith.constant 0 : index
    %c0_14 = arith.constant 0 : index
    %19 = vector.load %arg4[%c0_12, %c0_13, %c0_14] : memref<1x8x128xf32, #tpu.memory_space<vmem>>, vector<1x8x128xf32>
    tpu.vector_store %arg4[%c0_12, %c0_13, %c0_14], %18 {strides = array<i32>} : memref<1x8x128xf32, #tpu.memory_space<vmem>>, vector<1x8x128xf32>,
    %c0_15 = arith.constant 0 : index
    %c0_16 = arith.constant 0 : index
    %c0_17 = arith.constant 0 : index
    %20 = vector.load %arg5[%c0_15, %c0_16, %c0_17] : memref<1x8x128xf32, #tpu.memory_space<vmem>>, vector<1x8x128xf32>
    %21 = vector.shape_cast %7 : vector<1x8x128xf32> to vector<1x1x8x128xf32>
    %cst_18 = arith.constant dense<0.000000e+00> : vector<1x8x128xf32>
    %22 = vector.multi_reduction <add>, %21, %cst_18 [1] : vector<1x1x8x128xf32> to vector<1x8x128xf32>
    %23 = arith.addf %20, %22 : vector<1x8x128xf32>
    %c0_19 = arith.constant 0 : index
    %c0_20 = arith.constant 0 : index
    %c0_21 = arith.constant 0 : index
    %24 = vector.load %arg5[%c0_19, %c0_20, %c0_21] : memref<1x8x128xf32, #tpu.memory_space<vmem>>, vector<1x8x128xf32>
    tpu.vector_store %arg5[%c0_19, %c0_20, %c0_21], %23 {strides = array<i32>} : memref<1x8x128xf32, #tpu.memory_space<vmem>>, vector<1x8x128xf32>,
    %c0_22 = arith.constant 0 : index
    %c0_23 = arith.constant 0 : index
    %c0_24 = arith.constant 0 : index
    %25 = vector.load %arg6[%c0_22, %c0_23, %c0_24] : memref<1x8x128xf32, #tpu.memory_space<vmem>>, vector<1x8x128xf32>
    %26 = vector.shape_cast %14 : vector<1x8x128xf32> to vector<1x1x8x128xf32>
    %cst_25 = arith.constant dense<0.000000e+00> : vector<1x8x128xf32>
    %27 = vector.multi_reduction <add>, %26, %cst_25 [1] : vector<1x1x8x128xf32> to vector<1x8x128xf32>
    %28 = arith.addf %25, %27 : vector<1x8x128xf32>
    %c0_26 = arith.constant 0 : index
    %c0_27 = arith.constant 0 : index
    %c0_28 = arith.constant 0 : index
    %29 = vector.load %arg6[%c0_26, %c0_27, %c0_28] : memref<1x8x128xf32, #tpu.memory_space<vmem>>, vector<1x8x128xf32>
    tpu.vector_store %arg6[%c0_26, %c0_27, %c0_28], %28 {strides = array<i32>} : memref<1x8x128xf32, #tpu.memory_space<vmem>>, vector<1x8x128xf32>,
    return
  }
  func.func @transform_0(%arg0: i32, %arg1: i32) -> (i32, i32, i32) {
    %c0_i32 = arith.constant 0 : i32
    %c0_i32_0 = arith.constant 0 : i32
    return %arg0, %arg1, %c0_i32 : i32, i32, i32
  }
  func.func @transform_1(%arg0: i32, %arg1: i32) -> (i32, i32, i32) {
    %c0_i32 = arith.constant 0 : i32
    %c0_i32_0 = arith.constant 0 : i32
    return %arg0, %arg1, %c0_i32 : i32, i32, i32
  }
  func.func @transform_2(%arg0: i32, %arg1: i32) -> (i32, i32, i32) {
    %c0_i32 = arith.constant 0 : i32
    %c0_i32_0 = arith.constant 0 : i32
    %c0_i32_1 = arith.constant 0 : i32
    return %arg0, %c0_i32, %c0_i32_0 : i32, i32, i32
  }
  func.func @transform_3(%arg0: i32, %arg1: i32) -> (i32, i32, i32) {
    %c0_i32 = arith.constant 0 : i32
    %c0_i32_0 = arith.constant 0 : i32
    %c0_i32_1 = arith.constant 0 : i32
    return %arg0, %c0_i32, %c0_i32_0 : i32, i32, i32
  }
  func.func @transform_4(%arg0: i32, %arg1: i32) -> (i32, i32, i32) {
    %c0_i32 = arith.constant 0 : i32
    %c0_i32_0 = arith.constant 0 : i32
    %c0_i32_1 = arith.constant 0 : i32
    return %arg0, %c0_i32, %c0_i32_0 : i32, i32, i32
  }
}

</mosaic_0001>

<bundles_post_ra>
// kernel: tpu_custom_call.1
= control target key start
LH: loop header
LB: loop body
LE: loop exit
PB: predicated region body
PF: predicated region fallthrough
CT: control target
= control target key end

     0   :  { %10 = vsyncpa [#allocation3], 0  ;;  %s1169_s0 = inlined_call_operand.hbm [shape: f32[2,8,128], index: 0, kind: input, shape index: {}]   ;;  %s1170_s1 = inlined_call_operand.hbm [shape: f32[2,8,128], index: 1, kind: input, shape index: {}]   ;;  %s1171_s2 = inlined_call_operand.hbm [shape: f32[2,8,128], index: 2, kind: output, shape index: {0}]   ;;  %s1172_s3 = inlined_call_operand.hbm [shape: f32[2,8,128], index: 3, kind: output, shape index: {1}]   ;;  %s1173_s4 = inlined_call_operand.hbm [shape: f32[2,8,128], index: 4, kind: output, shape index: {2}]  }
   0x1   :  { %12 = vsyncpa [#allocation3 + $0x1], 0 }
   0x2   :  { %13 = vsyncpa [#allocation6], 0 }
   0x3   :  { %15 = vsyncpa [#allocation6 + $0x1], 0 }
   0x4   :  { %16 = vsyncpa [#allocation4], 0 }
   0x5   :  { %18 = vsyncpa [#allocation4 + $0x1], 0 }
   0x6   :  { %19 = vsyncpa [#allocation9], 0 }
   0x7   :  { %21 = vsyncpa [#allocation9 + $0x1], 0  ;;  %s867_s15 = smov 0   ;;  %s869_s16 = smov 0  }
   0x8   :  { %s871_s17 = smov 0   ;;  %s873_s18 = smov 0  }
   0x9   :  { %s875_s19 = smov 0   ;;  %s877_s20 = smov 0  }
   0xa LB: > { %s898_s21 = sadd.s32 4294967295, %s835_s20   ;;  %s1174_s22 = sadd.s32 4294967294, %s835_s20   ;;  %s835_s20 = sphi %s877_s20, %s27_s20   ;;  %s831_s19 = sphi %s875_s19, %s1197_s19   ;;  %s827_s18 = sphi %s873_s18, %s1196_s18   ;;  %s823_s17 = sphi %s871_s17, %s1195_s17   ;;  %s819_s16 = sphi %s869_s16, %s1194_s16   ;;  %s815_s15 = sphi %s867_s15, %s1193_s15  }
   0xb   : > { %s39_s23 = sadd.s32 1, %s831_s19  ;;  %s48_s24 = sadd.s32 1, %s823_s17 }
   0xc   : > { %p41_p0 = scmp.ge.s32.totalorder %s39_s23, 2  ;;  %p55_p1 = scmp.ne.s32.totalorder %s823_s17, %s819_s16 }
   0xd   : > { %p56_p2 = scmp.eq.s32.totalorder %s835_s20, 0  ;;  %p61_p3 = scmp.ne.s32.totalorder %s819_s16, %s815_s15 }
   0xe   : > { %s1199_s23 = smov (%p41_p0, %s39_s23), 0  ;;  %p62_p5 = scmp.eq.s32.totalorder %s898_s21, 0 }
   0xf   : > { %p910_p4 = por %p56_p2, %p55_p1  ;;  %s43_s26 = ssub.s32 %s831_s19, %s1199_s23 }
  0x10   : > { %p113_p6 = scmp.eq.s32.totalorder %s898_s21, 1  ;;  %p46_p7 = scmp.eq.s32.totalorder %s43_s26, 0 }
  0x11   : > { %p918_p8 = por %p62_p5, %p61_p3  ;;  %p119_p10 = scmp.eq.s32.totalorder %s1174_s22, 1 }
  0x12   : > { %p922_p9 = por %p113_p6, %p55_p1  ;;  %p578_p13 = scmp.lt.s32.totalorder %s835_s20, 2 }
  0x13   : > { %s1179_s27 = scalar_select %p918_p8, 1, 0 }
  0x14   : > { %s1180_s28 = scalar_select %p922_p9, 1, 0 }
  0x15   : > { %s929_s29 = scalar_select %p46_p7, %s823_s17, %s48_s24  }
  0x16   : > { %p931_p11 = por %p119_p10, %p61_p3  ;;  %s938_s5 = sand.u32 1, %s823_s17  }
  0x17   : > { %s532_s6 = sshll.u32 %s938_s5, 3  ;;  %s533_s7 = sshll.u32 %s831_s19, 7 }
  0x18   : > { %s1181_s30 = scalar_select %p931_p11, 1, 0 }
  0x19   : > { %s947_s10 = scalar_lea.hbm %s1169_s0, %s533_s7  ;;  %s195_s11 = scalar_lea.vmem [#allocation2], %s532_s6 }
  0x1a   : > { %s203_s12 = sshll.u32 %s195_s11, 4  ;;  %p955_p0 = pnand %p578_p13, %p910_p4  ;;  %s951_s12 = int_to_ptr.vmem [resolvable:$true] %s203_s12 }
  0x1b   : > { %s192_s14 = scalar_lea.sflag [#allocation3], %s938_s5  ;;  %s629_s24 = scalar_lea.hbm %s947_s10, 128 }
  0x1c   : > { %p630_p3 = scmp.ne.s32.totalorder %s947_s10, %s629_s24  ;;  %p631_p5 = pneg %p955_p0 }
  0x1d   : > { %s634_s25 = scalar_lea.hbm %s1169_s0, 256  ;;  %p635_p4 = scmp.lt.u32.totalorder %s947_s10, %s1169_s0 }
  0x1e   : > { %p632_p6 = pnand %p631_p5, %p630_p3  ;;  %p636_p10 = scmp.lt.u32.totalorder %s634_s25, %s629_s24 }
  0x1f   : > { %p638_p12 = scmp.lt.u32.totalorder %s629_s24, %s947_s10 }
  0x20   : > { %p633_p7 = pneg %p632_p6  ;;  %p637_p13 = por %p636_p10, %p635_p4 }
  0x22   : > { %p639_p1 = por %p638_p12, %p637_p13 }
  0x24   : > { %p640_p2 = pnand %p639_p1, %p633_p7 }
  0x26   : > { %643 = shalt.err (!%p640_p2)
}
  0x27   : > { %s644_s22 = scalar_lea.vmem %s951_s12, 128  ;;  %s837_s26 = smov [#allocation2]  }
  0x28   : > { %p645_p3 = scmp.ne.s32.totalorder %s951_s12, %s644_s22  ;;  %s649_s8 = sshll.u32 %s837_s26, 4  ;;  %s650_s8 = int_to_ptr.vmem [resolvable:$false] %s649_s8 }
  0x29   : > { %s651_s9 = scalar_lea.vmem %s650_s8, 256  ;;  %p652_p9 = scmp.lt.s32.totalorder %s951_s12, %s650_s8 }
  0x2a   : > { %p647_p6 = pnand %p645_p3, %p631_p5  ;;  %p653_p4 = scmp.lt.s32.totalorder %s651_s9, %s644_s22 }
  0x2c   : > { %p648_p11 = pneg %p647_p6  ;;  %p654_p10 = por %p653_p4, %p652_p9 }
  0x2e   : > { %p655_p12 = pnand %p654_p10, %p648_p11 }
  0x30   : > { %658 = shalt.err (!%p655_p12)
}
  0x31   : > { %564 = dma.hbm_to_vmem [thread:$0]  (!%p955_p0), %s947_s10, 128, %s951_s12, %s192_s14  }
  0x32   : > { %p1183_p1 = scmp.lt.s32.totalorder %s835_s20, 3  ;;  %p1184_p2 = scmp.ge.s32.totalorder %s835_s20, 1 }
  0x33   : > { %s1000_s11 = scalar_lea.hbm %s1170_s1, %s533_s7  ;;  %s214_s26 = scalar_lea.vmem [#allocation5], %s532_s6 }
  0x34   : > { %p991_p7 = pnand %p1184_p2, %p1183_p1  ;;  %s222_s8 = sshll.u32 %s214_s26, 4  ;;  %s223_s8 = int_to_ptr.vmem [resolvable:$true] %s222_s8 }
  0x35   : > { %s211_s10 = scalar_lea.sflag [#allocation6], %s938_s5  ;;  %s659_s12 = scalar_lea.hbm %s1000_s11, 128 }
  0x36   : > { %s1185_s24 = scalar_select %p991_p7, 1, 0 }
  0x37   : > { %p660_p9 = scmp.ne.s32.totalorder %s1000_s11, %s659_s12  ;;  %s664_s7 = scalar_lea.hbm %s1170_s1, 256 }
  0x38   : > { %p665_p3 = scmp.lt.u32.totalorder %s1000_s11, %s1170_s1  ;;  %p666_p6 = scmp.lt.u32.totalorder %s664_s7, %s659_s12 }
  0x39   : > { %p662_p11 = pnand %p660_p9, %p631_p5  ;;  %p668_p10 = scmp.lt.u32.totalorder %s659_s12, %s1000_s11 }
  0x3a   : > { %p667_p4 = por %p666_p6, %p665_p3 }
  0x3b   : > { %p663_p13 = pneg %p662_p11 }
  0x3c   : > { %p669_p12 = por %p668_p10, %p667_p4 }
  0x3e   : > { %p670_p1 = pnand %p669_p12, %p663_p13 }
  0x40   : > { %673 = shalt.err (!%p670_p1)
}
  0x41   : > { %s674_s5 = scalar_lea.vmem %s223_s8, 128  ;;  %s838_s6 = smov [#allocation5]  }
  0x42   : > { %p675_p2 = scmp.ne.s32.totalorder %s223_s8, %s674_s5  ;;  %s679_s26 = sshll.u32 %s838_s6, 4  ;;  %s680_s26 = int_to_ptr.vmem [resolvable:$false] %s679_s26 }
  0x43   : > { %s681_s14 = scalar_lea.vmem %s680_s26, 256  ;;  %p682_p8 = scmp.lt.s32.totalorder %s223_s8, %s680_s26 }
  0x44   : > { %p677_p9 = pnand %p675_p2, %p631_p5  ;;  %p683_p7 = scmp.lt.s32.totalorder %s681_s14, %s674_s5 }
  0x46   : > { %p678_p11 = pneg %p677_p9  ;;  %p684_p3 = por %p683_p7, %p682_p8 }
  0x48   : > { %p685_p6 = pnand %p684_p3, %p678_p11 }
  0x4a   : > { %688 = shalt.err (!%p685_p6)
}
  0x4b   : > { %567 = dma.hbm_to_vmem [thread:$0]  (!%p955_p0), %s1000_s11, 128, %s223_s8, %s211_s10  }
  0x4c   : > { %p1186_p13 = scmp.ne.s32.totalorder %s1185_s24, 0 }
  0x4d   : > { %s1027_s12 = sand.u32 (!%p1186_p13), 1, %s819_s16   ;;  %p1187_p8 = scmp.ne.s32.totalorder (!%p1186_p13), %s1179_s27, 0 }
  0x4e   : > { %231 = sbr.rel (%p1186_p13) target bundleno = 163 (0xa3), region = 28  ;;  %s1030_s9 = sshll.u32 (!%p1186_p13), %s1027_s12, 3 }
  0x4f   : > { %s234_s7 = scalar_lea.sflag (!%p1186_p13), [#allocation3], %s1027_s12  ;;  %s237_s22 = scalar_lea.vmem (!%p1186_p13), [#allocation2], %s1030_s9 }
  0x55   : > { %798 = dma.done.wait (%p1187_p8), %s234_s7, 128  }
  0x56   : > { %800 = vsyncadd (%p1187_p8), %s234_s7, 4294967168  ;;  %s243_s13 = scalar_lea.sflag [#allocation6], %s1027_s12  ;;  %s246_s24 = scalar_lea.vmem [#allocation5], %s1030_s9 }
  0x57   : > { %802 = dma.done.wait (%p1187_p8), %s243_s13, 128  }
  0x58   : > { %804 = vsyncadd (%p1187_p8), %s243_s13, 4294967168  ;;  %v293_v0 = vld [vmem:[%s237_s22] sm:$0xff]  ;;  %v294_v1 = vld [vmem:[%s246_s24] sm:$0xff]  ;;  %s319_s11 = sand.u32 1, %s898_s21   ;;  %s1046_s8 = sshll.u32 %s827_s18, 7 }
  0x59   : > { %v295_v2 = vsub.f32 %v293_v0, %v294_v1  ;;  %s278_s10 = scalar_lea.vmem [#allocation8], %s1030_s9  ;;  %s271_s27 = scalar_lea.vmem [#allocation7], %s1030_s9 }
  0x5a   : > { %s351_s25 = sshll.u32 %s278_s10, 4  ;;  %s338_s5 = sshll.u32 %s271_s27, 4  ;;  %s1056_s25 = int_to_ptr.vmem [resolvable:$true] %s351_s25  ;;  %s1064_s5 = int_to_ptr.vmem [resolvable:$true] %s338_s5 }
  0x5b   : > { %v297_v3 = vand.u32 2147483647, %v295_v2  ;;  %v296_v4 = vmul.f32 %v295_v2, %v295_v2  ;;  %s1054_s14 = scalar_lea.hbm %s1172_s3, %s1046_s8  ;;  %s1062_s7 = scalar_lea.hbm %s1171_s2, %s1046_s8 }
  0x5c   : > { %s1177_s22 = scalar_lea.vmem [#allocation10], %s1030_s9  ;;  %s1071_s24 = scalar_lea.sflag [#allocation9], %s319_s11 }
  0x5d   : > { %v299_v5 = vmul.f32 10.0, %v297_v3  ;;  %vm298_vm0 = vcmp.le.f32.partialorder %v297_v3, 5.0  ;;  %s1069_s13 = sshll.u32 %s1177_s22, 4  ;;  %309 = vst [vmem:[%s278_s10] sm:$0xff] %v297_v3  ;;  %305 = vst [vmem:[%s271_s27] sm:$0xff] %v296_v4  ;;  %s689_s6 = scalar_lea.vmem %s1056_s25, 128  ;;  %s1119_s13 = int_to_ptr.vmem [resolvable:$true] %s1069_s13 }
  0x5e   : > { %p690_p0 = scmp.ne.s32.totalorder %s1056_s25, %s689_s6  ;;  %p1188_p5 = scmp.ne.s32.totalorder %s1180_s28, 0 }
  0x5f   : > { %v542_v6 = vadd.f32 -25.0, %v299_v5  ;;  %s839_s26 = smov [#allocation8]  }
  0x60   : > { %p691_p7 = pnand %p690_p0, %p1188_p5  ;;  %s693_s18 = sshll.u32 %s839_s26, 4  ;;  %s694_s18 = int_to_ptr.vmem [resolvable:$false] %s693_s18 }
  0x61   : > { %s695_s21 = scalar_lea.vmem %s694_s18, 256  ;;  %p696_p10 = scmp.lt.s32.totalorder %s1056_s25, %s694_s18 }
  0x62   : > { %p692_p4 = pneg %p691_p7  ;;  %p697_p12 = scmp.lt.s32.totalorder %s695_s21, %s689_s6 }
  0x64   : > { %p698_p1 = por %p697_p12, %p696_p10 }
  0x66   : > { %p699_p2 = pnand %p698_p1, %p692_p4 }
  0x68   : > { %702 = shalt.err (!%p699_p2)
}
  0x69   : > { %s703_s11 = scalar_lea.hbm %s1054_s14, 128  ;;  %s707_s26 = scalar_lea.hbm %s1172_s3, 256 }
  0x6a   : > { %p704_p9 = scmp.ne.s32.totalorder %s1054_s14, %s703_s11  ;;  %p708_p6 = scmp.lt.u32.totalorder %s1054_s14, %s1172_s3 }
  0x6b   : > { %p709_p13 = scmp.lt.u32.totalorder %s707_s26, %s703_s11  ;;  %p711_p0 = scmp.lt.u32.totalorder %s703_s11, %s1054_s14 }
  0x6c   : > { %p705_p11 = pnand %p704_p9, %p1188_p5 }
  0x6d   : > { %p710_p8 = por %p709_p13, %p708_p6 }
  0x6e   : > { %p706_p3 = pneg %p705_p11 }
  0x6f   : > { %p712_p7 = por %p711_p0, %p710_p8 }
  0x71   : > { %p713_p4 = pnand %p712_p7, %p706_p3 }
  0x73   : > { %716 = shalt.err (!%p713_p4)
}
  0x74   : > { %556 = dma.vmem_to_hbm [thread:$0]  (%p1188_p5), %s1056_s25, 128, %s1054_s14, %s1071_s24   ;;  %v301_v7 = vsel %vm298_vm0, %v296_v4, %v542_v6 }
  0x75   : > { %s315_s22 = scalar_lea.sflag [#allocation4], %s1027_s12  ;;  %s717_s6 = scalar_lea.vmem %s1064_s5, 128 }
  0x76   : > { %p718_p10 = scmp.ne.s32.totalorder %s1064_s5, %s717_s6  ;;  %s840_s21 = smov [#allocation7]  }
  0x77   : > { %s721_s11 = sshll.u32 %s840_s21, 4  ;;  %s722_s11 = int_to_ptr.vmem [resolvable:$false] %s721_s11 }
  0x78   : > { %p719_p12 = pnand %p718_p10, %p1188_p5  ;;  %s723_s10 = scalar_lea.vmem %s722_s11, 256 }
  0x79   : > { %p724_p2 = scmp.lt.s32.totalorder %s1064_s5, %s722_s11  ;;  %p725_p9 = scmp.lt.s32.totalorder %s723_s10, %s717_s6 }
  0x7a   : > { %p720_p1 = pneg %p719_p12 }
  0x7b   : > { %p726_p11 = por %p725_p9, %p724_p2 }
  0x7d   : > { %p727_p3 = pnand %p726_p11, %p720_p1 }
  0x7f   : > { %730 = shalt.err (!%p727_p3)
}
  0x80   : > { %s731_s12 = scalar_lea.hbm %s1062_s7, 128  ;;  %s735_s27 = scalar_lea.hbm %s1171_s2, 256 }
  0x81   : > { %p732_p6 = scmp.ne.s32.totalorder %s1062_s7, %s731_s12  ;;  %p736_p0 = scmp.lt.u32.totalorder %s1062_s7, %s1171_s2 }
  0x82   : > { %p737_p7 = scmp.lt.u32.totalorder %s735_s27, %s731_s12  ;;  %p739_p10 = scmp.lt.u32.totalorder %s731_s12, %s1062_s7 }
  0x83   : > { %p733_p13 = pnand %p732_p6, %p1188_p5 }
  0x84   : > { %p738_p4 = por %p737_p7, %p736_p0 }
  0x85   : > { %p734_p8 = pneg %p733_p13 }
  0x86   : > { %p740_p12 = por %p739_p10, %p738_p4 }
  0x88   : > { %p741_p1 = pnand %p740_p12, %p734_p8 }
  0x8a   : > { %744 = shalt.err (!%p741_p1)
}
  0x8b   : > { %555 = dma.vmem_to_hbm [thread:$0]  (%p1188_p5), %s1064_s5, 128, %s1062_s7, %s315_s22  }
  0x8c   : > { %s362_s11 = scalar_lea.hbm %s1173_s4, %s1046_s8  ;;  %s1189_s10 = scalar_lea.vmem [#allocation10], %s1030_s9 }
  0x8d   : > { %313 = vst [vmem:[%s1189_s10] sm:$0xff] %v301_v7  ;;  %s745_s12 = scalar_lea.vmem %s1119_s13, 128  ;;  %s841_s25 = smov [#allocation10]  }
  0x8e   : > { %p746_p2 = scmp.ne.s32.totalorder %s1119_s13, %s745_s12  ;;  %s749_s14 = sshll.u32 %s841_s25, 4  ;;  %s750_s14 = int_to_ptr.vmem [resolvable:$false] %s749_s14 }
  0x8f   : > { %s751_s5 = scalar_lea.vmem %s750_s14, 256  ;;  %p752_p3 = scmp.lt.s32.totalorder %s1119_s13, %s750_s14 }
  0x90   : > { %p747_p9 = pnand %p746_p2, %p1188_p5  ;;  %p753_p6 = scmp.lt.s32.totalorder %s751_s5, %s745_s12 }
  0x92   : > { %p748_p11 = pneg %p747_p9  ;;  %p754_p13 = por %p753_p6, %p752_p3 }
  0x94   : > { %p755_p8 = pnand %p754_p13, %p748_p11 }
  0x96   : > { %758 = shalt.err (!%p755_p8)
}
  0x97   : > { %s759_s7 = scalar_lea.hbm %s362_s11, 128  ;;  %s763_s22 = scalar_lea.hbm %s1173_s4, 256 }
  0x98   : > { %p760_p0 = scmp.ne.s32.totalorder %s362_s11, %s759_s7  ;;  %p764_p10 = scmp.lt.u32.totalorder %s362_s11, %s1173_s4 }
  0x99   : > { %p765_p12 = scmp.lt.u32.totalorder %s763_s22, %s759_s7  ;;  %p767_p2 = scmp.lt.u32.totalorder %s759_s7, %s362_s11 }
  0x9a   : > { %p761_p7 = pnand %p760_p0, %p1188_p5 }
  0x9b   : > { %p766_p1 = por %p765_p12, %p764_p10 }
  0x9c   : > { %p762_p4 = pneg %p761_p7 }
  0x9d   : > { %p768_p9 = por %p767_p2, %p766_p1 }
  0x9f   : > { %p769_p11 = pnand %p768_p9, %p762_p4 }
  0xa1   : > { %772 = shalt.err (!%p769_p11)
}
  0xa2   : > { %557 = dma.vmem_to_hbm [thread:$0]  (%p1188_p5), %s1119_s13, 128, %s362_s11, %s1071_s24  }
  0xa3 PF: > { %s376_s18 = sand.u32 1, %s815_s15   ;;  %p1190_p3 = scmp.ne.s32.totalorder %s1181_s30, 0 }
  0xa4   : > { %p1191_p6 = scmp.ge.s32.totalorder %s835_s20, 2  ;;  %s377_s6 = scalar_lea.sflag [#allocation4], %s376_s18 }
  0xa6   : > { %p569_p13 = pnand %p1191_p6, %p1190_p3 }
  0xa8   : > { %806 = dma.done.wait (!%p569_p13), %s377_s6, 128  }
  0xa9   : > { %808 = vsyncadd (!%p569_p13), %s377_s6, 4294967168  ;;  %s1192_s21 = sadd.s32 4294967294, %s835_s20  }
  0xaa   : > { %s385_s10 = sand.u32 1, %s1192_s21  }
  0xab   : > { %s386_s12 = scalar_lea.sflag [#allocation9], %s385_s10 }
  0xac   : > { %810 = dma.done.wait (!%p569_p13), %s386_s12, 256  }
  0xad   : > { %812 = vsyncadd (!%p569_p13), %s386_s12, 4294967040  ;;  %s27_s20 = sadd.s32 1, %s835_s20   ;;  %s1193_s15 = smov %s819_s16 }
  0xae   : > { %p24_p5 = scmp.ge.s32.totalorder %s27_s20, 4   ;;  %s1194_s16 = smov %s823_s17 }
  0xaf   : > { %s1195_s17 = smov %s929_s29  ;;  %s1196_s18 = smov %s831_s19 }
  0xb0   : > { %s1197_s19 = smov %s1199_s23  ;;  %26 = sbr.rel (!%p24_p5) target bundleno = 10 (0xa), region = 122 }
  0xb7   :  { %400 = vsyncpa [#allocation3], 1 }
  0xb8   :  { %402 = vsyncpa [#allocation3 + $0x1], 1 }
  0xb9   :  { %403 = vsyncpa [#allocation6], 1 }
  0xba   :  { %405 = vsyncpa [#allocation6 + $0x1], 1 }
  0xbb   :  { %406 = vsyncpa [#allocation4], 1 }
  0xbc   :  { %408 = vsyncpa [#allocation4 + $0x1], 1 }
  0xbd   :  { %409 = vsyncpa [#allocation9], 1 }
  0xbe   :  { %411 = vsyncpa [#allocation9 + $0x1], 1 }

</bundles_post_ra>
